<compile_context>
chip_gen: v5e
topology: v5e:2x2
jax: 0.10.0
libtpu: 0.0.40
codegen_flags: <defaults>
</compile_context>

<pallas_src>
import jax
import jax.numpy as jnp
from jax.experimental import pallas as pl
from jax.experimental.pallas import tpu as pltpu


def _critic_kernel(state_ref, action_ref,
                   w1_ref, bn_ref,
                   w2s_ref, w2a_ref, fc23_ref,
                   b3_ref,
                   out_ref):
    # ---- fc1 + ReLU  (MXU: [B,S] x [S,fc1]) --------------------------------
    x = jnp.dot(state_ref[...], w1_ref[...],
                preferred_element_type=jnp.float32)
    x = jnp.maximum(x + bn_ref[0:1, :], 0.0)            # + b1, ReLU

    # ---- BatchNorm1d (training mode: batch stats, biased variance) ---------
    # One-pass statistics + folded affine:
    #   scale = gamma * rsqrt(var + eps);  shift = beta - mean * scale
    inv_n = 1.0 / x.shape[0]
    mean = jnp.sum(x, axis=0, keepdims=True) * inv_n
    mean_sq = jnp.sum(x * x, axis=0, keepdims=True) * inv_n
    var = mean_sq - mean * mean
    scale = bn_ref[1:2, :] * jax.lax.rsqrt(var + 1e-5)   # gamma row (EUP rsqrt)
    shift = bn_ref[2:3, :] - mean * scale                # beta row
    x = x * scale + shift

    # ---- concat([x, action]) @ W2  ==  x @ W2s + action @ W2a  (+ b2) ------
    h = (jnp.dot(x, w2s_ref[...], preferred_element_type=jnp.float32)
         + jnp.dot(action_ref[...], w2a_ref[...],
                   preferred_element_type=jnp.float32)
         + fc23_ref[0:1, :])                             # b2 row
    h = jnp.maximum(h, 0.0)

    # ---- fc3 as VPU mul + lane reduce (no degenerate [fc2,1] MXU tile) -----
    q = jnp.sum(h * fc23_ref[1:2, :], axis=-1, keepdims=True)   # w3 row
    out_ref[...] = q + b3_ref[0, 0]                       # scalar bias (SMEM)


def critic_forward(state, action, params):
    """Run the critic forward pass as a single fused Pallas kernel."""
    B = state.shape[0]
    (w1, bn_pack, w2s, w2a, fc23_pack, b3) = params

    vmem_inputs = (state, action, w1, bn_pack, w2s, w2a, fc23_pack)
    full_block = lambda a: pl.BlockSpec(a.shape, lambda: (0,) * a.ndim)
    in_specs = ([full_block(a) for a in vmem_inputs]
                + [pl.BlockSpec(memory_space=pltpu.MemorySpace.SMEM)])

    return pl.pallas_call(
        _critic_kernel,
        out_shape=jax.ShapeDtypeStruct((B, 1), jnp.float32),
        in_specs=in_specs,
        out_specs=pl.BlockSpec((B, 1), lambda: (0, 0)),
    )(*vmem_inputs, b3)


def init_params(key, full_state_size, actions_size, fc1_units, fc2_units):
    """Deterministic parameter init matching the PyTorch _init_weights()."""
    k1, k2, k3 = jax.random.split(key, 3)

    def xavier_uniform(k, fan_in, fan_out):
        limit = jnp.sqrt(6.0 / (fan_in + fan_out))
        # stored as [in, out] (transposed relative to torch's [out, in])
        return jax.random.uniform(k, (fan_in, fan_out), jnp.float32,
                                  minval=-limit, maxval=limit)

    w1 = xavier_uniform(k1, full_state_size, fc1_units)
    b1 = jnp.zeros((1, fc1_units), jnp.float32)
    gamma = jnp.ones((1, fc1_units), jnp.float32)     # BatchNorm1d defaults
    beta = jnp.zeros((1, fc1_units), jnp.float32)
    bn_pack = jnp.concatenate([b1, gamma, beta], axis=0)      # (3, fc1)

    w2 = xavier_uniform(k2, fc1_units + actions_size, fc2_units)
    w2s = w2[:fc1_units, :]          # state-branch slab of fc2
    w2a = w2[fc1_units:, :]          # action-branch slab of fc2
    b2 = jnp.zeros((1, fc2_units), jnp.float32)

    w3 = jax.random.uniform(k3, (fc2_units, 1), jnp.float32,
                            minval=-0.003, maxval=0.003)
    w3_row = w3.T                                              # (1, fc2)
    fc23_pack = jnp.concatenate([b2, w3_row], axis=0)          # (2, fc2)
    b3 = jnp.zeros((1, 1), jnp.float32)

    return (w1, bn_pack, w2s, w2a, fc23_pack, b3)


def critic_reference(state, action, params):
    """Pure-JAX reference (two-pass BN, explicit ops) for correctness."""
    (w1, bn_pack, w2s, w2a, fc23_pack, b3) = params
    b1, gamma, beta = bn_pack[0:1], bn_pack[1:2], bn_pack[2:3]
    b2, w3_row = fc23_pack[0:1], fc23_pack[1:2]

    x = jnp.maximum(state @ w1 + b1, 0.0)
    mean = jnp.mean(x, axis=0, keepdims=True)
    var = jnp.mean((x - mean) ** 2, axis=0, keepdims=True)
    x = (x - mean) / jnp.sqrt(var + 1e-5) * gamma + beta
    h = jnp.maximum(x @ w2s + action @ w2a + b2, 0.0)
    return h @ w3_row.T + b3


if __name__ == "__main__":
    # Small, forward-consistent shapes (e.g. Tennis: 2 agents x 24 obs, 2 x 2 act)
    B = 8
    FULL_STATE_SIZE = 48
    ACTIONS_SIZE = 4
    FC1_UNITS = 256
    FC2_UNITS = 128

    key = jax.random.PRNGKey(0)
    kp, ks, ka = jax.random.split(key, 3)

    params = init_params(kp, FULL_STATE_SIZE, ACTIONS_SIZE, FC1_UNITS, FC2_UNITS)
    state = jax.random.normal(ks, (B, FULL_STATE_SIZE), jnp.float32)
    action = jax.random.uniform(ka, (B, ACTIONS_SIZE), jnp.float32,
                                minval=-1.0, maxval=1.0)

    out = critic_forward(state, action, params)
    out = jax.block_until_ready(out)

    ref = critic_reference(state, action, params)
    assert out.shape == (B, 1), out.shape
    assert jnp.allclose(out, ref, atol=1e-4, rtol=1e-4), (
        f"mismatch: max abs diff {jnp.max(jnp.abs(out - ref))}")

    print("KERNEL_OK")
</pallas_src>

<mosaic_0001>
module attributes {stable_mosaic.version = 11 : i64} {
  func.func @_critic_kernel(%arg0: memref<8x48xf32, #tpu.memory_space<vmem>>, %arg1: memref<8x4xf32, #tpu.memory_space<vmem>>, %arg2: memref<48x256xf32, #tpu.memory_space<vmem>>, %arg3: memref<3x256xf32, #tpu.memory_space<vmem>>, %arg4: memref<256x128xf32, #tpu.memory_space<vmem>>, %arg5: memref<4x128xf32, #tpu.memory_space<vmem>>, %arg6: memref<2x128xf32, #tpu.memory_space<vmem>>, %arg7: memref<1x1xf32, #tpu.memory_space<smem>>, %arg8: memref<8x1xf32, #tpu.memory_space<vmem>>) attributes {dimension_semantics = [], scalar_prefetch = 0 : i64, scratch_operands = 0 : i64, tpu.core_type = #tpu.core_type<tc>} {
    %c0 = arith.constant 0 : index
    %c0_0 = arith.constant 0 : index
    %0 = vector.load %arg0[%c0, %c0_0] : memref<8x48xf32, #tpu.memory_space<vmem>>, vector<8x48xf32>
    %c0_1 = arith.constant 0 : index
    %c0_2 = arith.constant 0 : index
    %1 = vector.load %arg2[%c0_1, %c0_2] : memref<48x256xf32, #tpu.memory_space<vmem>>, vector<48x256xf32>
    %cst = arith.constant dense<0.000000e+00> : vector<8x256xf32>
    %2 = tpu.matmul %0, %1, %cst {dimension_numbers = #tpu.dot_dimension_numbers<[1], [0], [0], [1], [0, 0, 1, 1], [], []>} : vector<8x48xf32>, vector<48x256xf32>, vector<8x256xf32> -> vector<8x256xf32>
    %c0_3 = arith.constant 0 : index
    %c0_4 = arith.constant 0 : index
    %3 = vector.load %arg3[%c0_3, %c0_4] : memref<3x256xf32, #tpu.memory_space<vmem>>, vector<1x256xf32>
    %4 = vector.broadcast %3 : vector<1x256xf32> to vector<8x256xf32>
    %5 = arith.addf %2, %4 : vector<8x256xf32>
    %cst_5 = arith.constant 0.000000e+00 : f32
    %6 = vector.broadcast %cst_5 : f32 to vector<8x256xf32>
    %7 = arith.maximumf %5, %6 : vector<8x256xf32>
    %cst_6 = arith.constant dense<0.000000e+00> : vector<256xf32>
    %8 = vector.multi_reduction <add>, %7, %cst_6 [0] : vector<8x256xf32> to vector<256xf32>
    %9 = vector.shape_cast %8 : vector<256xf32> to vector<1x256xf32>
    %cst_7 = arith.constant 1.250000e-01 : f32
    %10 = vector.broadcast %cst_7 : f32 to vector<1x256xf32>
    %11 = arith.mulf %9, %10 : vector<1x256xf32>
    %12 = arith.mulf %7, %7 : vector<8x256xf32>
    %cst_8 = arith.constant dense<0.000000e+00> : vector<256xf32>
    %13 = vector.multi_reduction <add>, %12, %cst_8 [0] : vector<8x256xf32> to vector<256xf32>
    %14 = vector.shape_cast %13 : vector<256xf32> to vector<1x256xf32>
    %cst_9 = arith.constant 1.250000e-01 : f32
    %15 = vector.broadcast %cst_9 : f32 to vector<1x256xf32>
    %16 = arith.mulf %14, %15 : vector<1x256xf32>
    %17 = arith.mulf %11, %11 : vector<1x256xf32>
    %18 = arith.subf %16, %17 : vector<1x256xf32>
    %c1 = arith.constant 1 : index
    %c0_10 = arith.constant 0 : index
    %19 = vector.load %arg3[%c1, %c0_10] : memref<3x256xf32, #tpu.memory_space<vmem>>, vector<1x256xf32>
    %cst_11 = arith.constant 9.99999974E-6 : f32
    %20 = vector.broadcast %cst_11 : f32 to vector<1x256xf32>
    %21 = arith.addf %18, %20 : vector<1x256xf32>
    %22 = math.rsqrt %21 : vector<1x256xf32>
    %23 = arith.mulf %19, %22 : vector<1x256xf32>
    %c2 = arith.constant 2 : index
    %c0_12 = arith.constant 0 : index
    %24 = vector.load %arg3[%c2, %c0_12] : memref<3x256xf32, #tpu.memory_space<vmem>>, vector<1x256xf32>
    %25 = arith.mulf %11, %23 : vector<1x256xf32>
    %26 = arith.subf %24, %25 : vector<1x256xf32>
    %27 = vector.broadcast %23 : vector<1x256xf32> to vector<8x256xf32>
    %28 = arith.mulf %7, %27 : vector<8x256xf32>
    %29 = vector.broadcast %26 : vector<1x256xf32> to vector<8x256xf32>
    %30 = arith.addf %28, %29 : vector<8x256xf32>
    %c0_13 = arith.constant 0 : index
    %c0_14 = arith.constant 0 : index
    %31 = vector.load %arg4[%c0_13, %c0_14] : memref<256x128xf32, #tpu.memory_space<vmem>>, vector<256x128xf32>
    %cst_15 = arith.constant dense<0.000000e+00> : vector<8x128xf32>
    %32 = tpu.matmul %30, %31, %cst_15 {dimension_numbers = #tpu.dot_dimension_numbers<[1], [0], [0], [1], [0, 0, 1, 1], [], []>} : vector<8x256xf32>, vector<256x128xf32>, vector<8x128xf32> -> vector<8x128xf32>
    %c0_16 = arith.constant 0 : index
    %c0_17 = arith.constant 0 : index
    %33 = vector.load %arg1[%c0_16, %c0_17] : memref<8x4xf32, #tpu.memory_space<vmem>>, vector<8x4xf32>
    %c0_18 = arith.constant 0 : index
    %c0_19 = arith.constant 0 : index
    %34 = vector.load %arg5[%c0_18, %c0_19] : memref<4x128xf32, #tpu.memory_space<vmem>>, vector<4x128xf32>
    %cst_20 = arith.constant dense<0.000000e+00> : vector<8x128xf32>
    %35 = tpu.matmul %33, %34, %cst_20 {dimension_numbers = #tpu.dot_dimension_numbers<[1], [0], [0], [1], [0, 0, 1, 1], [], []>} : vector<8x4xf32>, vector<4x128xf32>, vector<8x128xf32> -> vector<8x128xf32>
    %36 = arith.addf %32, %35 : vector<8x128xf32>
    %c0_21 = arith.constant 0 : index
    %c0_22 = arith.constant 0 : index
    %37 = vector.load %arg6[%c0_21, %c0_22] : memref<2x128xf32, #tpu.memory_space<vmem>>, vector<1x128xf32>
    %38 = vector.broadcast %37 : vector<1x128xf32> to vector<8x128xf32>
    %39 = arith.addf %36, %38 : vector<8x128xf32>
    %cst_23 = arith.constant 0.000000e+00 : f32
    %40 = vector.broadcast %cst_23 : f32 to vector<8x128xf32>
    %41 = arith.maximumf %39, %40 : vector<8x128xf32>
    %c1_24 = arith.constant 1 : index
    %c0_25 = arith.constant 0 : index
    %42 = vector.load %arg6[%c1_24, %c0_25] : memref<2x128xf32, #tpu.memory_space<vmem>>, vector<1x128xf32>
    %43 = vector.broadcast %42 : vector<1x128xf32> to vector<8x128xf32>
    %44 = arith.mulf %41, %43 : vector<8x128xf32>
    %cst_26 = arith.constant dense<0.000000e+00> : vector<8xf32>
    %45 = vector.multi_reduction <add>, %44, %cst_26 [1] : vector<8x128xf32> to vector<8xf32>
    %46 = vector.shape_cast %45 : vector<8xf32> to vector<8x1xf32>
    %c0_27 = arith.constant 0 : index
    %c0_28 = arith.constant 0 : index
    %47 = memref.load %arg7[%c0_27, %c0_28] : memref<1x1xf32, #tpu.memory_space<smem>>
    %48 = vector.broadcast %47 : f32 to vector<8x1xf32>
    %49 = arith.addf %46, %48 : vector<8x1xf32>
    %c0_29 = arith.constant 0 : index
    %c0_30 = arith.constant 0 : index
    %50 = vector.load %arg8[%c0_29, %c0_30] : memref<8x1xf32, #tpu.memory_space<vmem>>, vector<8x1xf32>
    tpu.vector_store %arg8[%c0_29, %c0_30], %49 {strides = array<i32>} : memref<8x1xf32, #tpu.memory_space<vmem>>, vector<8x1xf32>,
    return
  }
}

</mosaic_0001>

<bundles_post_ra>
// kernel: tpu_custom_call.1
= control target key start
LH: loop header
LB: loop body
LE: loop exit
PB: predicated region body
PF: predicated region fallthrough
CT: control target
= control target key end

     0   :  { %14 = vsyncpa [#allocation4], 0  ;;  %s548_s0 = inlined_call_operand.vmem [shape: f32[8,48], index: 0, kind: input, shape index: {}]   ;;  %s549_s1 = inlined_call_operand.vmem [shape: f32[8,4], index: 1, kind: input, shape index: {}]   ;;  %s550_s2 = inlined_call_operand.hbm [shape: f32[48,256], index: 2, kind: input, shape index: {}]   ;;  %s551_s3 = inlined_call_operand.vmem [shape: f32[3,256], index: 3, kind: input, shape index: {}]   ;;  %s552_s4 = inlined_call_operand.hbm [shape: f32[256,128], index: 4, kind: input, shape index: {}]   ;;  %s553_s5 = inlined_call_operand.hbm [shape: f32[4,128], index: 5, kind: input, shape index: {}]   ;;  %s554_s6 = inlined_call_operand.vmem [shape: f32[2,128], index: 6, kind: input, shape index: {}]   ;;  %s555_s7 = inlined_call_operand.<no memory space> [shape: f32[1,1], index: 7, kind: input, shape index: {}]   ;;  %s556_s8 = inlined_call_operand.vmem [shape: f32[8,1], index: 8, kind: output, shape index: {}]  }
   0x1   :  { %15 = vsyncpa [#allocation6], 0  ;;  %s39_s29 = sshll.u32 %s552_s4, 4  ;;  %s446_s30 = smov [#allocation5]   ;;  %s40_s29 = int_to_ptr.hbm [resolvable:$true] %s39_s29 }
   0x2   :  { %s41_s9 = sshll.u32 %s446_s30, 4  ;;  %s24_s12 = sshll.u32 %s550_s2, 4  ;;  %s42_s9 = int_to_ptr.vmem [resolvable:$true] %s41_s9  ;;  %s25_s12 = int_to_ptr.hbm [resolvable:$true] %s24_s12 }
   0x3   :  { %s447_s13 = smov 128   ;;  %s448_s14 = smov 8  }
   0x4   :  { %47 = dma.hbm_to_vmem [thread:$0]  %s40_s29, 4096, %s42_s9, [#allocation6], %s447_s13, %s447_s13, %s448_s14  }
   0x5   :  { %s449_s15 = smov [#allocation3]   ;;  %s450_s17 = smov 256  }
   0x6   :  { %s26_s16 = sshll.u32 %s449_s15, 4  ;;  %s451_s18 = smov 16   ;;  %s27_s16 = int_to_ptr.vmem [resolvable:$true] %s26_s16 }
   0x7   :  { %32 = dma.hbm_to_vmem [thread:$0]  %s25_s12, 1536, %s27_s16, [#allocation4], %s450_s17, %s450_s17, %s451_s18  }
   0x8   :  { %s53_s20 = sshll.u32 %s553_s5, 4  ;;  %s452_s21 = smov [#allocation7]   ;;  %s54_s20 = int_to_ptr.hbm [resolvable:$true] %s53_s20 }
   0x9   :  { %s55_s22 = sshll.u32 %s452_s21, 4  ;;  %s56_s22 = int_to_ptr.vmem [resolvable:$true] %s55_s22 }
   0xa   :  { %58 = dma.hbm_to_vmem [thread:$0]  %s54_s20, 64, %s56_s22, [#allocation6]  }
   0xb   :  { %442 = dma.done.wait [#allocation4], 1536  }
   0xc   :  { %443 = vsyncadd [#allocation4], 4294965760 }
   0xd   :  { %444 = dma.done.wait [#allocation6], 4160  }
   0xe   :  { %445 = vsyncadd [#allocation6], 4294963136  ;;  %v86_v0 = vld [vmem:[#allocation3 + $0x50] sm:$0xff]  ;;  %v87_v1 = vld [vmem:[#allocation3 + $0x58] sm:$0xff]  ;;  %vm94_vm0 = vcmask 392192   ;;  %vm267_vm1 = vcmask 1043456  }
   0xf   :  { %v84_v2 = vld [vmem:[#allocation3 + $0x40] sm:$0xff]  ;;  %108 = vmatpush.msra.mxu0 %v86_v0  ;;  %128 = vmatpush.msra.mxu1 %v87_v1  ;;  %v85_v3 = vld [vmem:[#allocation3 + $0x48] sm:$0xff]  ;;  %v82_v4 = vld [vmem:[#allocation3 + $0x30] sm:$0xff]  ;;  %vm263_vm2 = vcmask 31744   ;;  %vm201_vm8 = vcmask 1040384   ;;  %vm343_vm10 = vcmask 7168  }
  0x10   :  { %v83_v5 = vld [vmem:[#allocation3 + $0x38] sm:$0xff]  ;;  %v80_v6 = vld [vmem:[#allocation3 + $0x20] sm:$0xff]  ;;  %v81_v7 = vld [vmem:[#allocation3 + $0x28] sm:$0xff] }
  0x11   :  { %109 = vmatpush.msra.mxu0 %v84_v2  ;;  %129 = vmatpush.msra.mxu1 %v85_v3  ;;  %v78_v8 = vld [vmem:[#allocation3 + $0x10] sm:$0xff]  ;;  %v79_v9 = vld [vmem:[#allocation3 + $0x18] sm:$0xff]  ;;  %v76_v10 = vld [vmem:[#allocation3] sm:$0xff] }
  0x12   :  { %v77_v11 = vld [vmem:[#allocation3 + $0x8] sm:$0xff]  ;;  %v75_v12 = vld [vmem:[%s548_s0] sm:$0xff]  ;;  %v244_v13 = vld [vmem:[#allocation5 + $0x78] sm:$0xff] }
  0x13   :  { %110 = vmatpush.msra.mxu0 %v82_v4  ;;  %130 = vmatpush.msra.mxu1 %v83_v5  ;;  %v260_v14 = vld [vmem:[#allocation5 + $0xf8] sm:$0xff]  ;;  %v243_v15 = vld [vmem:[#allocation5 + $0x70] sm:$0xff]  ;;  %v242_v17 = vld [vmem:[#allocation5 + $0x68] sm:$0xff] }
  0x14   :  { %291 = vmatpush.msra.mxu3 %v244_v13  ;;  %311 = vmatpush.msra.mxu2 %v260_v14  ;;  %v259_v16 = vld [vmem:[#allocation5 + $0xf0] sm:$0xff]  ;;  %v258_v18 = vld [vmem:[#allocation5 + $0xe8] sm:$0xff]  ;;  %v241_v19 = vld [vmem:[#allocation5 + $0x60] sm:$0xff] }
  0x15   :  { %111 = vmatpush.msra.mxu0 %v80_v6  ;;  %131 = vmatpush.msra.mxu1 %v81_v7  ;;  %v257_v20 = vld [vmem:[#allocation5 + $0xe0] sm:$0xff]  ;;  %v240_v21 = vld [vmem:[#allocation5 + $0x58] sm:$0xff]  ;;  %v239_v24 = vld [vmem:[#allocation5 + $0x50] sm:$0xff] }
  0x16   :  { %292 = vmatpush.msra.mxu3 %v243_v15  ;;  %312 = vmatpush.msra.mxu2 %v259_v16  ;;  %v256_v22 = vld [vmem:[#allocation5 + $0xd8] sm:$0xff]  ;;  %v88_v23 = vld [vmem:[%s551_s3] ss:$4 sm:$0x3]  ;;  %v255_v25 = vld [vmem:[#allocation5 + $0xd0] sm:$0xff] }
  0x17   :  { %112 = vmatpush.msra.mxu0 %v78_v8  ;;  %132 = vmatpush.msra.mxu1 %v79_v9  ;;  %v90_v26 = vperm.slane %v88_v23, 0  ;;  %v91_v27 = vperm.slane %v88_v23, 1  ;;  %v238_v28 = vld [vmem:[#allocation5 + $0x48] sm:$0xff]  ;;  %v262_v30 = vld [vmem:[#allocation7] sm:$0xf]  ;;  %v236_v37 = vld [vmem:[#allocation5 + $0x38] sm:$0xff] }
  0x18   :  { %293 = vmatpush.msra.mxu3 %v242_v17  ;;  %313 = vmatpush.msra.mxu2 %v258_v18  ;;  %v254_v29 = vld [vmem:[#allocation5 + $0xc8] sm:$0xff]  ;;  %v237_v31 = vld [vmem:[#allocation5 + $0x40] sm:$0xff]  ;;  %v252_v38 = vld [vmem:[#allocation5 + $0xb8] sm:$0xff] }
  0x19   :  { %113 = vmatpush.msra.mxu0 %v76_v10  ;;  %133 = vmatpush.msra.mxu1 %v77_v11  ;;  %v253_v32 = vld [vmem:[#allocation5 + $0xc0] sm:$0xff]  ;;  %v235_v41 = vld [vmem:[#allocation5 + $0x30] sm:$0xff]  ;;  %v234_v47 = vld [vmem:[#allocation5 + $0x28] sm:$0xff] }
  0x1a   :  { %351 = vmatmul.msk.f32.vlgmr.msra.gmra.mxu0 %vm94_vm0, %v75_v12  ;;  %352 = vmatmul.msk.f32.vlgmr.msra.gmra.mxu1 %vm94_vm0, %v75_v12  ;;  %v251_v42 = vld [vmem:[#allocation5 + $0xb0] sm:$0xff]  ;;  %v250_v48 = vld [vmem:[#allocation5 + $0xa8] sm:$0xff]  ;;  %v233_v53 = vld [vmem:[#allocation5 + $0x20] sm:$0xff] }
  0x1b   :  { %294 = vmatpush.msra.mxu3 %v241_v19  ;;  %314 = vmatpush.msra.mxu2 %v257_v20  ;;  %v249_v54 = vld [vmem:[#allocation5 + $0xa0] sm:$0xff]  ;;  %v232_v59 = vld [vmem:[#allocation5 + $0x18] sm:$0xff]  ;;  %v231_v1 = vld [vmem:[#allocation5 + $0x10] sm:$0xff] }
  0x1c   :  { %355 = vmatpush.msk.msrb.mxu0 %vm267_vm1, %v262_v30  ;;  %v248_v60 = vld [vmem:[#allocation5 + $0x98] sm:$0xff]  ;;  %v247_v2 = vld [vmem:[#allocation5 + $0x90] sm:$0xff]  ;;  %v230_v6 = vld [vmem:[#allocation5 + $0x8] sm:$0xff] }
  0x1d   :  { %295 = vmatpush.msra.mxu3 %v240_v21  ;;  %315 = vmatpush.msra.mxu2 %v256_v22  ;;  %v246_v7 = vld [vmem:[#allocation5 + $0x88] sm:$0xff]  ;;  %v229_v12 = vld [vmem:[#allocation5] sm:$0xff] }
  0x1e   :  { %v245_v13 = vld [vmem:[#allocation5 + $0x80] sm:$0xff] }
  0x1f   :  { %296 = vmatpush.msra.mxu3 %v239_v24  ;;  %316 = vmatpush.msra.mxu2 %v255_v25 }
  0x21   :  { %297 = vmatpush.msra.mxu3 %v238_v28  ;;  %317 = vmatpush.msra.mxu2 %v254_v29 }
  0x23   :  { %298 = vmatpush.msra.mxu3 %v237_v31  ;;  %318 = vmatpush.msra.mxu2 %v253_v32 }
  0x25   :  { %299 = vmatpush.msra.mxu3 %v236_v37  ;;  %319 = vmatpush.msra.mxu2 %v252_v38 }
  0x27   :  { %300 = vmatpush.msra.mxu3 %v235_v41  ;;  %320 = vmatpush.msra.mxu2 %v251_v42 }
  0x29   :  { %301 = vmatpush.msra.mxu3 %v234_v47  ;;  %321 = vmatpush.msra.mxu2 %v250_v48 }
  0x2b   :  { %302 = vmatpush.msra.mxu3 %v233_v53  ;;  %322 = vmatpush.msra.mxu2 %v249_v54 }
  0x2d   :  { %303 = vmatpush.msra.mxu3 %v232_v59  ;;  %323 = vmatpush.msra.mxu2 %v248_v60 }
  0x2f   :  { %304 = vmatpush.msra.mxu3 %v231_v1  ;;  %324 = vmatpush.msra.mxu2 %v247_v2  ;;  %v364_v1 = vld [vmem:[%s554_s6] ss:$0 sm:$0xff] }
  0x31   :  { %305 = vmatpush.msra.mxu3 %v230_v6  ;;  %325 = vmatpush.msra.mxu2 %v246_v7  ;;  %v341_v6 = vstv %s555_s7 }
  0x33   :  { %306 = vmatpush.msra.mxu3 %v229_v12  ;;  %326 = vmatpush.msra.mxu2 %v245_v13 }
  0x97   :  { %v115_v33 = vpop.f32.mrf.mxu0  ;;  %v135_v34 = vpop.f32.mrf.mxu1 }
  0x98   :  { %v116_v35 = vadd.f32 %v115_v33, %v90_v26  ;;  %v136_v36 = vadd.f32 %v135_v34, %v91_v27  ;;  %v261_v27 = vld [vmem:[%s549_s1] sm:$0xff] }
  0x99   :  { %356 = vmatmul.msk.f32.vlgmr.msrb.gmra.mxu0 %vm263_vm2, %v261_v27 }
  0x9a   :  { %v513_v39 = vmax.f32 %v116_v35, 0.0  ;;  %v515_v40 = vmax.f32 %v136_v36, 0.0 }
  0x9c   :  { %v140_v43 = vrot.slane %v513_v39, 4  ;;  %v154_v44 = vmul.f32 %v513_v39, %v513_v39  ;;  %v146_v45 = vrot.slane %v515_v40, 4  ;;  %v155_v46 = vmul.f32 %v515_v40, %v515_v40 }
  0x9e   :  { %v141_v49 = vadd.f32 %v140_v43, %v513_v39  ;;  %v156_v50 = vrot.slane %v154_v44, 4  ;;  %v147_v51 = vadd.f32 %v146_v45, %v515_v40  ;;  %v162_v52 = vrot.slane %v155_v46, 4  ;;  %v353_v43 = vld [vmem:[%s551_s3 + $0x1] ss:$4 sm:$0x3] }
  0xa0   :  { %v142_v55 = vrot.slane %v141_v49, 2  ;;  %v157_v56 = vadd.f32 %v156_v50, %v154_v44  ;;  %v148_v57 = vrot.slane %v147_v51, 2  ;;  %v163_v58 = vadd.f32 %v162_v52, %v155_v46 }
  0xa2   :  { %v143_v61 = vadd.f32 %v142_v55, %v141_v49  ;;  %v158_v62 = vrot.slane %v157_v56, 2  ;;  %v149_v63 = vadd.f32 %v148_v57, %v147_v51  ;;  %v164_v0 = vrot.slane %v163_v58, 2  ;;  %v354_v51 = vld [vmem:[%s551_s3 + $0x2] ss:$4 sm:$0x3] }
  0xa4   :  { %v159_v3 = vadd.f32 %v158_v62, %v157_v56  ;;  %v150_v4 = vrot.slane %v149_v63, 1  ;;  %v165_v5 = vadd.f32 %v164_v0, %v163_v58  ;;  %v144_v8 = vrot.slane %v143_v61, 1 }
  0xa6   :  { %v160_v9 = vrot.slane %v159_v3, 1  ;;  %v151_v10 = vadd.f32 %v150_v4, %v149_v63  ;;  %v166_v11 = vrot.slane %v165_v5, 1  ;;  %v145_v14 = vadd.f32 %v144_v8, %v143_v61 }
  0xa8   :  { %v161_v15 = vadd.f32 %v160_v9, %v159_v3  ;;  %v167_v16 = vadd.f32 %v166_v11, %v165_v5  ;;  %v152_v17 = vmul.f32 0.125, %v145_v14  ;;  %v153_v18 = vmul.f32 0.125, %v151_v10 }
  0xaa   :  { %v169_v19 = vmul.f32 0.125, %v167_v16  ;;  %v168_v20 = vmul.f32 0.125, %v161_v15  ;;  %v170_v21 = vmul.f32 %v152_v17, %v152_v17  ;;  %v171_v22 = vmul.f32 %v153_v18, %v153_v18 }
  0xac   :  { %v172_v23 = vsub.f32 %v168_v20, %v170_v21  ;;  %v173_v24 = vsub.f32 %v169_v19, %v171_v22 }
  0xae   :  { %v176_v25 = vadd.f32 1e-05, %v172_v23  ;;  %v177_v26 = vadd.f32 1e-05, %v173_v24 }
  0xb0   :  { %366 = vrsqrt.f32 %v176_v25  ;;  %vm194_vm5 = vweird.f32 %v177_v26  ;;  %vm184_vm7 = vweird.f32 %v176_v25 }
  0xb1   :  { %368 = vrsqrt.f32 %v177_v26 }
  0xb6   :  { %v367_v28 = vpop.eup %366 }
  0xb7   :  { %v369_v29 = vpop.eup %368  ;;  %v179_v30 = vmul.f32 %v367_v28, %v176_v25  ;;  %vm185_vm4 = vweird.f32 %v367_v28 }
  0xb8   :  { %v189_v31 = vmul.f32 %v369_v29, %v177_v26  ;;  %vm195_vm3 = vweird.f32 %v369_v29  ;;  %vm186_vm9 = vmor %vm184_vm7, %vm185_vm4 }
  0xb9   :  { %v180_v32 = vmul.f32 %v367_v28, %v179_v30  ;;  %vm196_vm6 = vmor %vm194_vm5, %vm195_vm3 }
  0xba   :  { %v190_v33 = vmul.f32 %v369_v29, %v189_v31 }
  0xbb   :  { %v181_v34 = vmul.f32 0.5, %v180_v32 }
  0xbc   :  { %v191_v35 = vmul.f32 0.5, %v190_v33 }
  0xbd   :  { %v182_v36 = vsub.f32 1.5, %v181_v34 }
  0xbe   :  { %v192_v37 = vsub.f32 1.5, %v191_v35 }
  0xbf   :  { %v183_v38 = vmul.f32 %v367_v28, %v182_v36 }
  0xc0   :  { %v193_v41 = vmul.f32 %v369_v29, %v192_v37 }
  0xc1   :  { %v187_v45 = vsel %vm186_vm9, %v367_v28, %v183_v38 }
  0xc2   :  { %v197_v42 = vsel %vm196_vm6, %v369_v29, %v193_v41 }
  0xc3   :  { %v200_v44 = vrot.slane %v197_v42, 7 }
  0xc5   :  { %v202_v46 = vsel %vm201_vm8, %v187_v45, %v200_v44 }
  0xc6   :  { %v204_v47 = vmul.f32 %v353_v43, %v202_v46 }
  0xc8   :  { %v208_v48 = vperm.slane %v204_v47, 0  ;;  %v209_v49 = vperm.slane %v204_v47, 1 }
  0xca   :  { %v213_v50 = vmul.f32 %v209_v49, %v153_v18  ;;  %v212_v52 = vmul.f32 %v208_v48, %v152_v17  ;;  %v220_v56 = vmul.f32 %v208_v48, %v513_v39  ;;  %v221_v58 = vmul.f32 %v209_v49, %v515_v40  ;;  %v365_v39 = vld [vmem:[%s554_s6 + $0x1] ss:$0 sm:$0xff] }
  0xcc   :  { %v216_v53 = vrot.slane %v213_v50, 7 }
  0xce   :  { %v217_v54 = vsel %vm201_vm8, %v212_v52, %v216_v53 }
  0xcf   :  { %v219_v55 = vsub.f32 %v354_v51, %v217_v54 }
  0xd1   :  { %v223_v57 = vperm.slane %v219_v55, 0  ;;  %v224_v59 = vperm.slane %v219_v55, 1 }
  0xd3   :  { %v227_v60 = vadd.f32 %v223_v57, %v220_v56  ;;  %v228_v61 = vadd.f32 %v224_v59, %v221_v58 }
  0xd5   :  { %307 = vmatmul.f32.vlgmr.msra.gmra.mxu3 %v227_v60  ;;  %327 = vmatmul.f32.vlgmr.msra.gmra.mxu2 %v228_v61 }
 0x116   :  { %v288_v62 = vpop.f32.mrf.mxu0 }
 0x158   :  { %v308_v63 = vpop.f32.mrf.mxu3  ;;  %v328_v2 = vpop.f32.mrf.mxu2 }
 0x159   :  { %v309_v0 = vadd.f32 %v308_v63, %v288_v62 }
 0x15b   :  { %v329_v3 = vadd.f32 %v328_v2, %v309_v0 }
 0x15d   :  { %v333_v4 = vadd.f32 %v364_v1, %v329_v3 }
 0x15f   :  { %v334_v40 = vmax.f32 %v333_v4, 0.0 }
 0x161   :  { %v337_v5 = vmul.f32 %v365_v39, %v334_v40 }
 0x163   :  { %338 = vadd.xlane.f32.xlu0 %v337_v5 }
 0x1d6   :  { %v339_v7 = vpop.xlane.xlu0 %338 }
 0x1d7   :  { %v342_v8 = vadd.f32 %v341_v6, %v339_v7 }
 0x1d9   :  { %344 = vst.msk [vmem:[%s556_s8] sm:$0xff] %vm343_vm10, %v342_v8 }
 0x1da   :  { %349 = vsyncpa [#allocation4], 1 }
 0x1db   :  { %350 = vsyncpa [#allocation6], 1 }

</bundles_post_ra>
